<compile_context>
chip_gen: v7x
topology: tpu7x:2x2x1
jax: 0.10.0
libtpu: 0.0.40
codegen_flags: <defaults>
</compile_context>

<pallas_src>
import functools

import jax
import jax.numpy as jnp
from jax.experimental import pallas as pl
from jax.experimental.pallas import tpu as pltpu


# --------------------------------------------------------------------------
# Kernel: fused 3-layer MLP, batched over the agent axis (stacked weights).
# --------------------------------------------------------------------------
def munet_kernel(x_ref, w1_ref, b1_ref, w2_ref, b2_ref, w3_ref, b3_ref, o_ref,
                 *, compute_dtype):
    # x_ref : (A, TB, n_obs)  f32
    # w1_ref: (A, n_obs, H1)  bf16     b1_ref: (A, 1, H1)  f32
    # w2_ref: (A, H1,   H2)   bf16     b2_ref: (A, 1, H2)  f32
    # w3_ref: (A, H2,   NA)   bf16     b3_ref: (A, 1, NA)  f32
    # o_ref : (A, TB, NA)     f32
    x = x_ref[...].astype(compute_dtype)
    h1 = jnp.einsum("abn,anh->abh", x, w1_ref[...],
                    preferred_element_type=jnp.float32) + b1_ref[...]
    h1 = jnp.maximum(h1, 0.0).astype(compute_dtype)
    h2 = jnp.einsum("abh,ahk->abk", h1, w2_ref[...],
                    preferred_element_type=jnp.float32) + b2_ref[...]
    h2 = jnp.maximum(h2, 0.0).astype(compute_dtype)
    out = jnp.einsum("abk,akm->abm", h2, w3_ref[...],
                     preferred_element_type=jnp.float32) + b3_ref[...]
    # NOTE: NA(=8) < 128 lanes -> masked partial stores; negligible here.
    o_ref[...] = out.astype(o_ref.dtype)


# --------------------------------------------------------------------------
# Parameter packing: keep weights stacked [A, d_in, d_out]; cast to bf16 once.
# --------------------------------------------------------------------------
def pack_params(params, weight_dtype=jnp.bfloat16):
    return dict(
        w1=params["w1"].astype(weight_dtype), b1=params["b1"].astype(jnp.float32),
        w2=params["w2"].astype(weight_dtype), b2=params["b2"].astype(jnp.float32),
        w3=params["w3"].astype(weight_dtype), b3=params["b3"].astype(jnp.float32),
    )


# --------------------------------------------------------------------------
# Wrapper
# --------------------------------------------------------------------------
def munet_forward(obs, packed, *, block_b=None):
    """obs: [B, A, n_obs] float32; packed: output of pack_params.
    Returns action logits [B, A, num_action] (matches PyTorch MuNet.forward)."""
    B, A, n_obs = obs.shape
    w1, b1 = packed["w1"], packed["b1"]
    w2, b2 = packed["w2"], packed["b2"]
    w3, b3 = packed["w3"], packed["b3"]
    assert w1.shape[0] == A and w1.shape[1] == n_obs
    H1, H2, NA = w1.shape[-1], w2.shape[-1], w3.shape[-1]

    # Tiny transpose (A<=~16, n_obs~16): puts the agent batch dim first so the
    # kernel runs a standard batched matmul over agents.
    x = jnp.transpose(obs, (1, 0, 2))  # [A, B, n_obs]

    flops = 2 * B * A * (n_obs * H1 + H1 * H2 + H2 * NA)
    bytes_accessed = (
        sum(int(a.size) * a.dtype.itemsize for a in (x, w1, b1, w2, b2, w3, b3))
        + A * B * NA * 4
    )
    cost = pl.CostEstimate(flops=flops, transcendentals=0,
                           bytes_accessed=bytes_accessed)

    kernel = functools.partial(munet_kernel, compute_dtype=w1.dtype)
    out_shape = jax.ShapeDtypeStruct((A, B, NA), jnp.float32)
    args = (x, w1, b1, w2, b2, w3, b3)

    if block_b is None or block_b >= B:
        # Small batch: single grid-less call, everything VMEM-resident.
        vmem = pl.BlockSpec(memory_space=pltpu.MemorySpace.VMEM)
        out = pl.pallas_call(
            kernel,
            out_shape=out_shape,
            in_specs=[vmem] * 7,
            out_specs=vmem,
            cost_estimate=cost,
        )(*args)
    else:
        # Large batch: tile over B. Weights/biases use constant index_maps so
        # they stay VMEM-resident (no re-DMA per tile); only x/out advance.
        assert B % block_b == 0, "pad batch to a multiple of block_b"
        nb = B // block_b

        def const_spec(arr):
            return pl.BlockSpec(arr.shape, lambda i: (0, 0, 0))

        out = pl.pallas_call(
            kernel,
            out_shape=out_shape,
            grid=(nb,),
            in_specs=[
                pl.BlockSpec((A, block_b, n_obs), lambda i: (0, i, 0)),
                const_spec(w1), const_spec(b1),
                const_spec(w2), const_spec(b2),
                const_spec(w3), const_spec(b3),
            ],
            out_specs=pl.BlockSpec((A, block_b, NA), lambda i: (0, i, 0)),
            compiler_params=pltpu.CompilerParams(
                dimension_semantics=("parallel",)),  # v7x: shard B tiles over 2 TCs
            cost_estimate=cost,
        )(*args)

    return jnp.transpose(out, (1, 0, 2))  # [B, A, NA]


# --------------------------------------------------------------------------
# Init + pure-JAX reference (for correctness check)
# --------------------------------------------------------------------------
def init_params(key, num_agents, n_obs, num_action, weight_multiplier=1):
    """PyTorch-style uniform(-1/sqrt(fan_in), +1/sqrt(fan_in)) init."""
    H1 = int(128 * weight_multiplier)
    H2 = int(64 * weight_multiplier)

    def lin(k, fan_in, fan_out):
        kw, kb = jax.random.split(k)
        bound = 1.0 / jnp.sqrt(fan_in)
        w = jax.random.uniform(kw, (num_agents, fan_in, fan_out),
                               jnp.float32, -bound, bound)
        b = jax.random.uniform(kb, (num_agents, 1, fan_out),
                               jnp.float32, -bound, bound)
        return w, b

    k1, k2, k3 = jax.random.split(key, 3)
    w1, b1 = lin(k1, n_obs, H1)
    w2, b2 = lin(k2, H1, H2)
    w3, b3 = lin(k3, H2, num_action)
    return dict(w1=w1, b1=b1, w2=w2, b2=b2, w3=w3, b3=b3)


def munet_reference(obs, params):
    def per_agent(x, w1, b1, w2, b2, w3, b3):
        h1 = jnp.maximum(x @ w1 + b1, 0.0)
        h2 = jnp.maximum(h1 @ w2 + b2, 0.0)
        return h2 @ w3 + b3

    outs = []
    A = obs.shape[1]
    for a in range(A):
        outs.append(per_agent(obs[:, a, :],
                              params["w1"][a], params["b1"][a][0],
                              params["w2"][a], params["b2"][a][0],
                              params["w3"][a], params["b3"][a][0])[:, None, :])
    return jnp.concatenate(outs, axis=1)


if __name__ == "__main__":
    key = jax.random.PRNGKey(0)
    k_obs, k_params, k_obs_big = jax.random.split(key, 3)

    num_agents = 4
    obs_dim = 13                          # observation_space[i].shape[0]
    n_obs = obs_dim + (num_agents - 1)    # 16, per MuNet.__init__
    num_action = 8                        # action_space[i].n

    params = init_params(k_params, num_agents, n_obs, num_action)
    packed = pack_params(params)          # one-time stacking + bf16 cast

    # Small batch: single grid-less call (matches the RL inference use case).
    batch = 2
    obs = jax.random.normal(k_obs, (batch, num_agents, n_obs), jnp.float32)
    out = jax.block_until_ready(munet_forward(obs, packed))
    ref = munet_reference(obs, params)
    assert out.shape == (batch, num_agents, num_action)
    assert jnp.allclose(out, ref, atol=2e-2, rtol=2e-2)  # bf16 weights -> looser tol

    # Larger batch: exercise the B-tiled grid path (VMEM-resident weights,
    # "parallel" B axis for v7x megacore).
    big_batch = 256
    obs_big = jax.random.normal(k_obs_big, (big_batch, num_agents, n_obs),
                                jnp.float32)
    out_big = jax.block_until_ready(munet_forward(obs_big, packed, block_b=128))
    ref_big = munet_reference(obs_big, params)
    assert out_big.shape == (big_batch, num_agents, num_action)
    assert jnp.allclose(out_big, ref_big, atol=2e-2, rtol=2e-2)

    print("KERNEL_OK")
</pallas_src>

<mosaic_0001>
module attributes {stable_mosaic.version = 11 : i64} {
  func.func @munet_kernel(%arg0: memref<4x2x16xf32, #tpu.memory_space<vmem>>, %arg1: memref<4x16x128xbf16, #tpu.memory_space<vmem>>, %arg2: memref<4x1x128xf32, #tpu.memory_space<vmem>>, %arg3: memref<4x128x64xbf16, #tpu.memory_space<vmem>>, %arg4: memref<4x1x64xf32, #tpu.memory_space<vmem>>, %arg5: memref<4x64x8xbf16, #tpu.memory_space<vmem>>, %arg6: memref<4x1x8xf32, #tpu.memory_space<vmem>>, %arg7: memref<4x2x8xf32, #tpu.memory_space<vmem>>) attributes {dimension_semantics = [], scalar_prefetch = 0 : i64, scratch_operands = 0 : i64, tpu.core_type = #tpu.core_type<tc>} {
    %c0 = arith.constant 0 : index
    %c0_0 = arith.constant 0 : index
    %c0_1 = arith.constant 0 : index
    %0 = vector.load %arg0[%c0, %c0_0, %c0_1] : memref<4x2x16xf32, #tpu.memory_space<vmem>>, vector<4x2x16xf32>
    %1 = arith.truncf %0 : vector<4x2x16xf32> to vector<4x2x16xbf16>
    %c0_2 = arith.constant 0 : index
    %c0_3 = arith.constant 0 : index
    %c0_4 = arith.constant 0 : index
    %2 = vector.load %arg1[%c0_2, %c0_3, %c0_4] : memref<4x16x128xbf16, #tpu.memory_space<vmem>>, vector<4x16x128xbf16>
    "tpu.trace_start"() <{level = 10 : i32, message = "abn,anh->abh"}> : () -> ()
    %cst = arith.constant dense<0.000000e+00> : vector<4x2x128xf32>
    %3 = tpu.matmul %1, %2, %cst {dimension_numbers = #tpu.dot_dimension_numbers<[2], [1], [1], [2], [0, 0, 0, 1, 1, 2], [0], [0]>} : vector<4x2x16xbf16>, vector<4x16x128xbf16>, vector<4x2x128xf32> -> vector<4x2x128xf32>
    "tpu.trace_stop"() : () -> ()
    %c0_5 = arith.constant 0 : index
    %c0_6 = arith.constant 0 : index
    %c0_7 = arith.constant 0 : index
    %4 = vector.load %arg2[%c0_5, %c0_6, %c0_7] : memref<4x1x128xf32, #tpu.memory_space<vmem>>, vector<4x1x128xf32>
    %5 = vector.broadcast %4 : vector<4x1x128xf32> to vector<4x2x128xf32>
    %6 = arith.addf %3, %5 : vector<4x2x128xf32>
    %cst_8 = arith.constant 0.000000e+00 : f32
    %7 = vector.broadcast %cst_8 : f32 to vector<4x2x128xf32>
    %8 = arith.maximumf %6, %7 : vector<4x2x128xf32>
    %9 = arith.truncf %8 : vector<4x2x128xf32> to vector<4x2x128xbf16>
    %c0_9 = arith.constant 0 : index
    %c0_10 = arith.constant 0 : index
    %c0_11 = arith.constant 0 : index
    %10 = vector.load %arg3[%c0_9, %c0_10, %c0_11] : memref<4x128x64xbf16, #tpu.memory_space<vmem>>, vector<4x128x64xbf16>
    "tpu.trace_start"() <{level = 10 : i32, message = "abh,ahk->abk"}> : () -> ()
    %cst_12 = arith.constant dense<0.000000e+00> : vector<4x2x64xf32>
    %11 = tpu.matmul %9, %10, %cst_12 {dimension_numbers = #tpu.dot_dimension_numbers<[2], [1], [1], [2], [0, 0, 0, 1, 1, 2], [0], [0]>} : vector<4x2x128xbf16>, vector<4x128x64xbf16>, vector<4x2x64xf32> -> vector<4x2x64xf32>
    "tpu.trace_stop"() : () -> ()
    %c0_13 = arith.constant 0 : index
    %c0_14 = arith.constant 0 : index
    %c0_15 = arith.constant 0 : index
    %12 = vector.load %arg4[%c0_13, %c0_14, %c0_15] : memref<4x1x64xf32, #tpu.memory_space<vmem>>, vector<4x1x64xf32>
    %13 = vector.broadcast %12 : vector<4x1x64xf32> to vector<4x2x64xf32>
    %14 = arith.addf %11, %13 : vector<4x2x64xf32>
    %cst_16 = arith.constant 0.000000e+00 : f32
    %15 = vector.broadcast %cst_16 : f32 to vector<4x2x64xf32>
    %16 = arith.maximumf %14, %15 : vector<4x2x64xf32>
    %17 = arith.truncf %16 : vector<4x2x64xf32> to vector<4x2x64xbf16>
    %c0_17 = arith.constant 0 : index
    %c0_18 = arith.constant 0 : index
    %c0_19 = arith.constant 0 : index
    %18 = vector.load %arg5[%c0_17, %c0_18, %c0_19] : memref<4x64x8xbf16, #tpu.memory_space<vmem>>, vector<4x64x8xbf16>
    "tpu.trace_start"() <{level = 10 : i32, message = "abk,akm->abm"}> : () -> ()
    %cst_20 = arith.constant dense<0.000000e+00> : vector<4x2x8xf32>
    %19 = tpu.matmul %17, %18, %cst_20 {dimension_numbers = #tpu.dot_dimension_numbers<[2], [1], [1], [2], [0, 0, 0, 1, 1, 2], [0], [0]>} : vector<4x2x64xbf16>, vector<4x64x8xbf16>, vector<4x2x8xf32> -> vector<4x2x8xf32>
    "tpu.trace_stop"() : () -> ()
    %c0_21 = arith.constant 0 : index
    %c0_22 = arith.constant 0 : index
    %c0_23 = arith.constant 0 : index
    %20 = vector.load %arg6[%c0_21, %c0_22, %c0_23] : memref<4x1x8xf32, #tpu.memory_space<vmem>>, vector<4x1x8xf32>
    %21 = vector.broadcast %20 : vector<4x1x8xf32> to vector<4x2x8xf32>
    %22 = arith.addf %19, %21 : vector<4x2x8xf32>
    %c0_24 = arith.constant 0 : index
    %c0_25 = arith.constant 0 : index
    %c0_26 = arith.constant 0 : index
    %23 = vector.load %arg7[%c0_24, %c0_25, %c0_26] : memref<4x2x8xf32, #tpu.memory_space<vmem>>, vector<4x2x8xf32>
    tpu.vector_store %arg7[%c0_24, %c0_25, %c0_26], %22 {strides = array<i32>} : memref<4x2x8xf32, #tpu.memory_space<vmem>>, vector<4x2x8xf32>,
    return
  }
}

</mosaic_0001>

<bundles_post_ra>
// kernel: tpu_custom_call.1
= control target key start
LH: loop header
LB: loop body
LE: loop exit
PB: predicated region body
PF: predicated region fallthrough
CT: control target
= control target key end

     0   :  { %v1448_v1 = vmov 0.0   ;;  %vm1449_vm0 = vmmov 0   ;;  %vm78_vm1 = vcmask 130048   ;;  %s1797_s0 = inlined_call_operand.vmem [shape: f32[4,2,16], index: 0, kind: input, shape index: {}]   ;;  %s1798_s1 = inlined_call_operand.vmem [shape: bf16[4,16,128], index: 1, kind: input, shape index: {}]   ;;  %s1799_s2 = inlined_call_operand.vmem [shape: f32[4,1,128], index: 2, kind: input, shape index: {}]   ;;  %s1800_s3 = inlined_call_operand.vmem [shape: bf16[4,128,64], index: 3, kind: input, shape index: {}]   ;;  %s1801_s4 = inlined_call_operand.vmem [shape: f32[4,1,64], index: 4, kind: input, shape index: {}]   ;;  %s1802_s5 = inlined_call_operand.vmem [shape: bf16[4,64,8], index: 5, kind: input, shape index: {}]   ;;  %s1803_s6 = inlined_call_operand.vmem [shape: f32[4,1,8], index: 6, kind: input, shape index: {}]   ;;  %s1804_s7 = inlined_call_operand.hbm [shape: f32[4,2,8], index: 7, kind: output, shape index: {}]  }
   0x1   :  { %v1372_v0 = vld [vmem:[%s1798_s1] sm:$0xff]   ;;  %1215 = vmatprep.subr.bf16.mxu0 %v1448_v1  ;;  %1221 = vmatprep.subr.bf16.mxu1 %v1448_v1  ;;  %v1373_v2 = vld [vmem:[%s1798_s1 + $0x8] sm:$0xff]   ;;  %v1374_v5 = vld [vmem:[%s1798_s1 + $0x10] sm:$0xff]  }
   0x2   :  { %1216 = vmatpush3.bf16.msra.mxu0 %v1372_v0  ;;  %1217 = vmatprep.mubr.msk.bf16.mxu0 %vm1449_vm0, %v1448_v1  ;;  %v28_v3 = vld [vmem:[%s1797_s0] sm:$0x3]  ;;  %v29_v4 = vld [vmem:[%s1797_s0 + $0x2] sm:$0x3]  ;;  %v1375_v8 = vld [vmem:[%s1798_s1 + $0x18] sm:$0xff]  }
   0x3   :  { %1222 = vmatpush3.bf16.msra.mxu1 %v1373_v2  ;;  %1223 = vmatprep.mubr.msk.bf16.mxu1 %vm1449_vm0, %v1448_v1  ;;  %v32_v6 = vpack.c.bf16 %v28_v3, %v28_v3  ;;  %v33_v7 = vpack.c.bf16 %v29_v4, %v29_v4  ;;  %v30_v9 = vld [vmem:[%s1797_s0 + $0x4] sm:$0x3]  ;;  %v31_v10 = vld [vmem:[%s1797_s0 + $0x6] sm:$0x3]  ;;  %v1378_v15 = vld [vmem:[%s1800_s3 + $0x8] sm:$0xff]  }
   0x4   :  { %1227 = vmatprep.subr.bf16.mxu0 %v1448_v1  ;;  %1233 = vmatprep.subr.bf16.mxu1 %v1448_v1  ;;  %v34_v11 = vpack.c.bf16 %v30_v9, %v30_v9  ;;  %v35_v12 = vpack.c.bf16 %v31_v10, %v31_v10  ;;  %v1376_v13 = vld [vmem:[%s1800_s3] sm:$0xff]   ;;  %v1379_v16 = vld [vmem:[%s1800_s3 + $0x48] sm:$0xff]   ;;  %v1380_v17 = vld [vmem:[%s1800_s3 + $0x10] sm:$0xff]  }
   0x5   :  { %1218 = vmatmul.mubr.msk.bf16.vlgmr.msra.gmra.mrb[0].mxu0 %vm78_vm1, %v32_v6  ;;  %v1377_v14 = vld [vmem:[%s1800_s3 + $0x40] sm:$0xff]   ;;  %v1381_v18 = vld [vmem:[%s1800_s3 + $0x50] sm:$0xff]   ;;  %v1382_v19 = vld [vmem:[%s1800_s3 + $0x18] sm:$0xff]  }
   0x6   :  { %1224 = vmatmul.mubr.msk.bf16.vlgmr.msra.gmra.mrb[0].mxu1 %vm78_vm1, %v33_v7  ;;  %1228 = vmatpush3.bf16.msra.mxu0 %v1374_v5  ;;  %v1383_v20 = vld [vmem:[%s1800_s3 + $0x58] sm:$0xff]   ;;  %v1384_v21 = vld [vmem:[%s1800_s3 + $0x20] sm:$0xff]   ;;  %v1386_v23 = vld [vmem:[%s1800_s3 + $0x28] sm:$0xff]  }
   0x7   :  { %1234 = vmatpush3.bf16.msra.mxu1 %v1375_v8  ;;  %1229 = vmatprep.mubr.msk.bf16.mxu0 %vm1449_vm0, %v1448_v1  ;;  %v1385_v22 = vld [vmem:[%s1800_s3 + $0x60] sm:$0xff]   ;;  %v1387_v24 = vld [vmem:[%s1800_s3 + $0x68] sm:$0xff]   ;;  %v1388_v25 = vld [vmem:[%s1800_s3 + $0x30] sm:$0xff]  }
   0x8   :  { %1235 = vmatprep.mubr.msk.bf16.mxu1 %vm1449_vm0, %v1448_v1  ;;  %1239 = vmatprep.subr.bf16.mxu0 %v1448_v1  ;;  %v1389_v26 = vld [vmem:[%s1800_s3 + $0x70] sm:$0xff]  }
   0x9   :  { %1259 = vmatprep.subr.bf16.mxu1 %v1448_v1 }
   0xd   :  { %1230 = vmatmul.mubr.msk.bf16.vlgmr.msra.gmra.mrb[4].mxu0 %vm78_vm1, %v34_v11 }
   0xe   :  { %1236 = vmatmul.mubr.msk.bf16.vlgmr.msra.gmra.mrb[4].mxu1 %vm78_vm1, %v35_v12  ;;  %1240 = vmatpush3.bf16.msra.mxu0 %v1376_v13 }
   0xf   :  { %1260 = vmatpush3.bf16.msra.mxu1 %v1377_v14  ;;  %1241 = vmatprep.subr.bf16.mxu0 %v1448_v1 }
  0x10   :  { %1261 = vmatprep.subr.bf16.mxu1 %v1448_v1  ;;  %1255 = vmatprep.mubr.msk.bf16.mxu0 %vm1449_vm0, %v1448_v1 }
  0x11   :  { %1275 = vmatprep.mubr.msk.bf16.mxu1 %vm1449_vm0, %v1448_v1 }
  0x12   :  { %1242 = vmatpush3.bf16.msra.mxu0 %v1378_v15 }
  0x13   :  { %1262 = vmatpush3.bf16.msra.mxu1 %v1379_v16  ;;  %1243 = vmatprep.subr.bf16.mxu0 %v1448_v1 }
  0x14   :  { %1263 = vmatprep.subr.bf16.mxu1 %v1448_v1 }
  0x16   :  { %1244 = vmatpush3.bf16.msra.mxu0 %v1380_v17 }
  0x17   :  { %1264 = vmatpush3.bf16.msra.mxu1 %v1381_v18  ;;  %1245 = vmatprep.subr.bf16.mxu0 %v1448_v1 }
  0x18   :  { %1265 = vmatprep.subr.bf16.mxu1 %v1448_v1 }
  0x1a   :  { %1246 = vmatpush3.bf16.msra.mxu0 %v1382_v19 }
  0x1b   :  { %1266 = vmatpush3.bf16.msra.mxu1 %v1383_v20  ;;  %1247 = vmatprep.subr.bf16.mxu0 %v1448_v1 }
  0x1c   :  { %1267 = vmatprep.subr.bf16.mxu1 %v1448_v1 }
  0x1e   :  { %1248 = vmatpush3.bf16.msra.mxu0 %v1384_v21 }
  0x1f   :  { %1268 = vmatpush3.bf16.msra.mxu1 %v1385_v22  ;;  %1249 = vmatprep.subr.bf16.mxu0 %v1448_v1 }
  0x20   :  { %1269 = vmatprep.subr.bf16.mxu1 %v1448_v1 }
  0x22   :  { %1250 = vmatpush3.bf16.msra.mxu0 %v1386_v23 }
  0x23   :  { %1270 = vmatpush3.bf16.msra.mxu1 %v1387_v24  ;;  %1251 = vmatprep.subr.bf16.mxu0 %v1448_v1 }
  0x24   :  { %1271 = vmatprep.subr.bf16.mxu1 %v1448_v1 }
  0x26   :  { %1252 = vmatpush3.bf16.msra.mxu0 %v1388_v25 }
  0x27   :  { %1272 = vmatpush3.bf16.msra.mxu1 %v1389_v26  ;;  %1253 = vmatprep.subr.bf16.mxu0 %v1448_v1 }
  0x28   :  { %1273 = vmatprep.subr.bf16.mxu1 %v1448_v1 }
  0x29   :  { %12 = vsyncpa [#allocation3], 0  ;;  %v1390_v27 = vld [vmem:[%s1800_s3 + $0x38] sm:$0xff]   ;;  %v1079_v29 = vld [vmem:[%s1799_s2] ss:$0 sm:$0xff]  ;;  %vm813_vm2 = vcmask 523264  }
  0x2a   :  { %v1391_v28 = vld [vmem:[%s1800_s3 + $0x78] sm:$0xff]   ;;  %1254 = vmatpush3.bf16.msra.mxu0 %v1390_v27  ;;  %v1080_v30 = vld [vmem:[%s1799_s2 + $0x1] ss:$0 sm:$0xff]  ;;  %v1394_v47 = vld [vmem:[%s1800_s3 + $0x88] sm:$0xff]   ;;  %vm1058_vm3 = vcmask 58368   ;;  %s1450_s27 = smov [#allocation2]  }
  0x2b   :  { %1274 = vmatpush3.bf16.msra.mxu1 %v1391_v28  ;;  %1279 = vmatprep.subr.bf16.mxu0 %v1448_v1  ;;  %v1392_v43 = vld [vmem:[%s1800_s3 + $0x80] sm:$0xff]   ;;  %v1395_v49 = vld [vmem:[%s1800_s3 + $0xc8] sm:$0xff]   ;;  %v1396_v56 = vld [vmem:[%s1800_s3 + $0x90] sm:$0xff]   ;;  %s1068_s28 = sshll.u32 %s1450_s27, 4  ;;  %s1069_s28 = int_to_ptr.vmem [resolvable:$true] %s1068_s28 }
  0x2c   :  { %1299 = vmatprep.subr.bf16.mxu1 %v1448_v1  ;;  %v1393_v45 = vld [vmem:[%s1800_s3 + $0xc0] sm:$0xff]   ;;  %v1397_v58 = vld [vmem:[%s1800_s3 + $0xd0] sm:$0xff]   ;;  %v1398_v59 = vld [vmem:[%s1800_s3 + $0x98] sm:$0xff]   ;;  %s1424_s8 = scalar_lea.vmem %s1069_s28, 128  ;;  %p1429_p1 = scmp.lt.s32.totalorder %s1069_s28, %s1069_s28 }
  0x2d   :  { %v1399_v60 = vld [vmem:[%s1800_s3 + $0xd8] sm:$0xff]   ;;  %v1400_v61 = vld [vmem:[%s1800_s3 + $0xa0] sm:$0xff]   ;;  %v1402_v63 = vld [vmem:[%s1800_s3 + $0xa8] sm:$0xff]   ;;  %p1425_p0 = scmp.ne.s32.totalorder %s1069_s28, %s1424_s8  ;;  %p1430_p2 = scmp.lt.s32.totalorder %s1424_s8, %s1424_s8 }
  0x2e   :  { %v1401_v62 = vld [vmem:[%s1800_s3 + $0xe0] sm:$0xff]   ;;  %v1403_v2 = vld [vmem:[%s1800_s3 + $0xe8] sm:$0xff]   ;;  %v1404_v6 = vld [vmem:[%s1800_s3 + $0xb0] sm:$0xff]  }
  0x2f   :  { %v1081_v0 = vld [vmem:[%s1799_s2 + $0x2] ss:$0 sm:$0xff]  ;;  %v1082_v3 = vld [vmem:[%s1799_s2 + $0x3] ss:$0 sm:$0xff]  ;;  %v1405_v7 = vld [vmem:[%s1800_s3 + $0xf0] sm:$0xff]   ;;  %p1431_p3 = por %p1430_p2, %p1429_p1 }
  0x30   :  { %v1406_v10 = vld [vmem:[%s1800_s3 + $0xb8] sm:$0xff]   ;;  %v1408_v14 = vld [vmem:[%s1802_s5] sm:$0xff]   ;;  %v1410_v16 = vld [vmem:[%s1802_s5 + $0x8] sm:$0xff]  }
  0x31   :  { %v1407_v11 = vld [vmem:[%s1800_s3 + $0xf8] sm:$0xff]   ;;  %v1409_v15 = vld [vmem:[%s1802_s5 + $0x20] sm:$0xff]   ;;  %v1411_v17 = vld [vmem:[%s1802_s5 + $0x28] sm:$0xff]   ;;  %p1432_p4 = pnand %p1431_p3, %p1425_p0 }
  0x32   :  { %v1412_v18 = vld [vmem:[%s1802_s5 + $0x10] sm:$0xff]   ;;  %v1414_v20 = vld [vmem:[%s1802_s5 + $0x18] sm:$0xff]   ;;  %v1091_v22 = vld [vmem:[%s1801_s4] ss:$0 sm:$0xff] }
  0x33   :  { %v1413_v19 = vld [vmem:[%s1802_s5 + $0x30] sm:$0xff]   ;;  %v1415_v21 = vld [vmem:[%s1802_s5 + $0x38] sm:$0xff]   ;;  %v1092_v23 = vld [vmem:[%s1801_s4 + $0x1] ss:$0 sm:$0xff] }
  0xd8   :  { %v116_v31 = vpop.f32.mrb[0].mxu0 }
  0xd9   :  { %v117_v32 = vadd.f32 %v1079_v29, %v116_v31  ;;  %v165_v33 = vpop.f32.mrb[0].mxu1  ;;  %v1219_v34 = vpop.f32.mrb[1].mxu0 }
  0xda   :  { %v166_v35 = vadd.f32 %v1080_v30, %v165_v33  ;;  %v1225_v36 = vpop.f32.mrb[1].mxu1  ;;  %v119_v37 = vpop.f32.mrb[2].mxu0 }
  0xdb   :  { %v269_v38 = vmax.f32 %v117_v32, 0.0  ;;  %v168_v39 = vpop.f32.mrb[2].mxu1  ;;  %v1220_v40 = vpop.f32.mrb[3].mxu0  ;;  %v1416_v36 = vld [vmem:[%s1802_s5 + $0x40] sm:$0xff]  }
  0xdc   :  { %v270_v41 = vmax.f32 %v166_v35, 0.0  ;;  %v1226_v42 = vpop.f32.mrb[3].mxu1  ;;  %v1418_v40 = vld [vmem:[%s1802_s5 + $0x48] sm:$0xff]  }
  0xdd   :  { %v273_v44 = vpack.c.bf16 %v269_v38, %v269_v38  ;;  %v1417_v38 = vld [vmem:[%s1802_s5 + $0x60] sm:$0xff]   ;;  %v1420_v42 = vld [vmem:[%s1802_s5 + $0x50] sm:$0xff]  }
  0xde   :  { %v274_v46 = vpack.c.bf16 %v270_v41, %v270_v41  ;;  %v1419_v41 = vld [vmem:[%s1802_s5 + $0x68] sm:$0xff]  }
  0xdf   :  { %1256 = vmatmul.mubr.bf16.vlgmr.msra.gmra.mrb[8].mxu0 %v273_v44  ;;  %v1422_v44 = vld [vmem:[%s1802_s5 + $0x58] sm:$0xff]  }
  0xe0   :  { %1276 = vmatmul.mubr.bf16.vlgmr.msra.gmra.mrb[8].mxu1 %v274_v46  ;;  %1280 = vmatpush3.bf16.msra.mxu0 %v1392_v43  ;;  %v214_v48 = vpop.f32.mrb[4].mxu0  ;;  %v1421_v43 = vld [vmem:[%s1802_s5 + $0x70] sm:$0xff]   ;;  %v1093_v46 = vld [vmem:[%s1801_s4 + $0x2] ss:$0 sm:$0xff] }
  0xe1   :  { %1300 = vmatpush3.bf16.msra.mxu1 %v1393_v45  ;;  %1281 = vmatprep.subr.bf16.mxu0 %v1448_v1  ;;  %v263_v50 = vpop.f32.mrb[4].mxu1  ;;  %v1231_v51 = vpop.f32.mrb[5].mxu0  ;;  %v215_v4 = vadd.f32 %v1081_v0, %v214_v48  ;;  %v1423_v45 = vld [vmem:[%s1802_s5 + $0x78] sm:$0xff]  }
  0xe2   :  { %1301 = vmatprep.subr.bf16.mxu1 %v1448_v1  ;;  %v1237_v52 = vpop.f32.mrb[5].mxu1  ;;  %v217_v53 = vpop.f32.mrb[6].mxu0  ;;  %1295 = vmatprep.mubr.msk.bf16.mxu0 %vm1449_vm0, %v1448_v1  ;;  %v264_v5 = vadd.f32 %v1082_v3, %v263_v50 }
  0xe3   :  { %v266_v54 = vpop.f32.mrb[6].mxu1  ;;  %v1232_v55 = vpop.f32.mrb[7].mxu0  ;;  %1315 = vmatprep.mubr.msk.bf16.mxu1 %vm1449_vm0, %v1448_v1  ;;  %v271_v8 = vmax.f32 %v215_v4, 0.0 }
  0xe4   :  { %1282 = vmatpush3.bf16.msra.mxu0 %v1394_v47  ;;  %v1238_v57 = vpop.f32.mrb[7].mxu1  ;;  %v272_v9 = vmax.f32 %v264_v5, 0.0  ;;  %v1094_v47 = vld [vmem:[%s1801_s4 + $0x3] ss:$0 sm:$0xff] }
  0xe5   :  { %1302 = vmatpush3.bf16.msra.mxu1 %v1395_v49  ;;  %1283 = vmatprep.subr.bf16.mxu0 %v1448_v1  ;;  %v275_v12 = vpack.c.bf16 %v271_v8, %v271_v8 }
  0xe6   :  { %1303 = vmatprep.subr.bf16.mxu1 %v1448_v1  ;;  %v276_v13 = vpack.c.bf16 %v272_v9, %v272_v9 }
  0xe8   :  { %1284 = vmatpush3.bf16.msra.mxu0 %v1396_v56 }
  0xe9   :  { %1304 = vmatpush3.bf16.msra.mxu1 %v1397_v58  ;;  %1285 = vmatprep.subr.bf16.mxu0 %v1448_v1 }
  0xea   :  { %1305 = vmatprep.subr.bf16.mxu1 %v1448_v1 }
  0xec   :  { %1286 = vmatpush3.bf16.msra.mxu0 %v1398_v59 }
  0xed   :  { %1306 = vmatpush3.bf16.msra.mxu1 %v1399_v60  ;;  %1287 = vmatprep.subr.bf16.mxu0 %v1448_v1 }
  0xee   :  { %1307 = vmatprep.subr.bf16.mxu1 %v1448_v1 }
  0xf0   :  { %1288 = vmatpush3.bf16.msra.mxu0 %v1400_v61  ;;  %v1127_v61 = vld [vmem:[%s1803_s6] ss:$0 sm:$0xff] }
  0xf1   :  { %1308 = vmatpush3.bf16.msra.mxu1 %v1401_v62  ;;  %1289 = vmatprep.subr.bf16.mxu0 %v1448_v1  ;;  %v1128_v62 = vld [vmem:[%s1803_s6 + $0x1] ss:$0 sm:$0xff] }
  0xf2   :  { %1309 = vmatprep.subr.bf16.mxu1 %v1448_v1 }
  0xf4   :  { %1290 = vmatpush3.bf16.msra.mxu0 %v1402_v63 }
  0xf5   :  { %1310 = vmatpush3.bf16.msra.mxu1 %v1403_v2  ;;  %1291 = vmatprep.subr.bf16.mxu0 %v1448_v1 }
  0xf6   :  { %1311 = vmatprep.subr.bf16.mxu1 %v1448_v1 }
  0xf8   :  { %1292 = vmatpush3.bf16.msra.mxu0 %v1404_v6 }
  0xf9   :  { %1312 = vmatpush3.bf16.msra.mxu1 %v1405_v7  ;;  %1293 = vmatprep.subr.bf16.mxu0 %v1448_v1 }
  0xfa   :  { %1313 = vmatprep.subr.bf16.mxu1 %v1448_v1 }
  0xfc   :  { %1294 = vmatpush3.bf16.msra.mxu0 %v1406_v10  ;;  %v1129_v10 = vld [vmem:[%s1803_s6 + $0x2] ss:$0 sm:$0xff] }
  0xfd   :  { %1314 = vmatpush3.bf16.msra.mxu1 %v1407_v11  ;;  %1319 = vmatprep.subr.bf16.mxu0 %v1448_v1  ;;  %v1130_v11 = vld [vmem:[%s1803_s6 + $0x3] ss:$0 sm:$0xff] }
  0xfe   :  { %1331 = vmatprep.subr.bf16.mxu1 %v1448_v1 }
  0xff   :  { %1296 = vmatmul.mubr.bf16.vlgmr.msra.gmra.mrb[12].mxu0 %v275_v12 }
 0x100   :  { %1316 = vmatmul.mubr.bf16.vlgmr.msra.gmra.mrb[12].mxu1 %v276_v13  ;;  %1320 = vmatpush3.bf16.msra.mxu0 %v1408_v14 }
 0x101   :  { %1332 = vmatpush3.bf16.msra.mxu1 %v1409_v15  ;;  %1321 = vmatprep.subr.bf16.mxu0 %v1448_v1 }
 0x102   :  { %1333 = vmatprep.subr.bf16.mxu1 %v1448_v1  ;;  %1327 = vmatprep.mubr.msk.bf16.mxu0 %vm1449_vm0, %v1448_v1 }
 0x103   :  { %1339 = vmatprep.mubr.msk.bf16.mxu1 %vm1449_vm0, %v1448_v1 }
 0x104   :  { %1322 = vmatpush3.bf16.msra.mxu0 %v1410_v16 }
 0x105   :  { %1334 = vmatpush3.bf16.msra.mxu1 %v1411_v17  ;;  %1323 = vmatprep.subr.bf16.mxu0 %v1448_v1 }
 0x106   :  { %1335 = vmatprep.subr.bf16.mxu1 %v1448_v1 }
 0x108   :  { %1324 = vmatpush3.bf16.msra.mxu0 %v1412_v18 }
 0x109   :  { %1336 = vmatpush3.bf16.msra.mxu1 %v1413_v19  ;;  %1325 = vmatprep.subr.bf16.mxu0 %v1448_v1 }
 0x10a   :  { %1337 = vmatprep.subr.bf16.mxu1 %v1448_v1 }
 0x10c   :  { %1326 = vmatpush3.bf16.msra.mxu0 %v1414_v20 }
 0x10d   :  { %1338 = vmatpush3.bf16.msra.mxu1 %v1415_v21  ;;  %1343 = vmatprep.subr.bf16.mxu0 %v1448_v1 }
 0x10e   :  { %1355 = vmatprep.subr.bf16.mxu1 %v1448_v1 }
 0x1b2   :  { %v451_v24 = vpop.f32.mrb[8].mxu0 }
 0x1b3   :  { %v452_v25 = vadd.f32 %v1091_v22, %v451_v24  ;;  %v539_v26 = vpop.f32.mrb[8].mxu1  ;;  %v1257_v27 = vpop.f32.mrb[9].mxu0 }
 0x1b4   :  { %v540_v28 = vadd.f32 %v1092_v23, %v539_v26  ;;  %v1277_v29 = vpop.f32.mrb[9].mxu1  ;;  %v454_v30 = vpop.f32.mrb[10].mxu0 }
 0x1b5   :  { %v721_v31 = vmax.f32 %v452_v25, 0.0  ;;  %v542_v32 = vpop.f32.mrb[10].mxu1  ;;  %v1258_v33 = vpop.f32.mrb[11].mxu0 }
 0x1b6   :  { %v722_v34 = vmax.f32 %v540_v28, 0.0  ;;  %v1278_v35 = vpop.f32.mrb[11].mxu1 }
 0x1b7   :  { %v725_v37 = vpack.c.bf16 %v721_v31, %v721_v31 }
 0x1b8   :  { %v726_v39 = vpack.c.bf16 %v722_v34, %v722_v34 }
 0x1b9   :  { %1328 = vmatmul.mubr.msk.bf16.vlgmr.msra.gmra.mrb[16].mxu0 %vm813_vm2, %v725_v37 }
 0x1ba   :  { %1340 = vmatmul.mubr.msk.bf16.vlgmr.msra.gmra.mrb[16].mxu1 %vm813_vm2, %v726_v39  ;;  %1344 = vmatpush3.bf16.msra.mxu0 %v1416_v36 }
 0x1bb   :  { %1356 = vmatpush3.bf16.msra.mxu1 %v1417_v38  ;;  %1345 = vmatprep.subr.bf16.mxu0 %v1448_v1 }
 0x1bc   :  { %1357 = vmatprep.subr.bf16.mxu1 %v1448_v1  ;;  %1351 = vmatprep.mubr.msk.bf16.mxu0 %vm1449_vm0, %v1448_v1 }
 0x1bd   :  { %1363 = vmatprep.mubr.msk.bf16.mxu1 %vm1449_vm0, %v1448_v1 }
 0x1be   :  { %1346 = vmatpush3.bf16.msra.mxu0 %v1418_v40 }
 0x1bf   :  { %1358 = vmatpush3.bf16.msra.mxu1 %v1419_v41  ;;  %1347 = vmatprep.subr.bf16.mxu0 %v1448_v1 }
 0x1c0   :  { %1359 = vmatprep.subr.bf16.mxu1 %v1448_v1 }
 0x1c2   :  { %1348 = vmatpush3.bf16.msra.mxu0 %v1420_v42 }
 0x1c3   :  { %1360 = vmatpush3.bf16.msra.mxu1 %v1421_v43  ;;  %1349 = vmatprep.subr.bf16.mxu0 %v1448_v1 }
 0x1c4   :  { %1361 = vmatprep.subr.bf16.mxu1 %v1448_v1 }
 0x1c6   :  { %1350 = vmatpush3.bf16.msra.mxu0 %v1422_v44 }
 0x1c7   :  { %1362 = vmatpush3.bf16.msra.mxu1 %v1423_v45 }
 0x1d2   :  { %v627_v48 = vpop.f32.mrb[12].mxu0 }
 0x1d3   :  { %v628_v49 = vadd.f32 %v1093_v46, %v627_v48  ;;  %v715_v50 = vpop.f32.mrb[12].mxu1  ;;  %v1297_v51 = vpop.f32.mrb[13].mxu0 }
 0x1d4   :  { %v716_v52 = vadd.f32 %v1094_v47, %v715_v50  ;;  %v1317_v53 = vpop.f32.mrb[13].mxu1  ;;  %v630_v54 = vpop.f32.mrb[14].mxu0 }
 0x1d5   :  { %v723_v55 = vmax.f32 %v628_v49, 0.0  ;;  %v718_v56 = vpop.f32.mrb[14].mxu1  ;;  %v1298_v1 = vpop.f32.mrb[15].mxu0 }
 0x1d6   :  { %v724_v57 = vmax.f32 %v716_v52, 0.0  ;;  %v1318_v58 = vpop.f32.mrb[15].mxu1 }
 0x1d7   :  { %v727_v59 = vpack.c.bf16 %v723_v55, %v723_v55 }
 0x1d8   :  { %v728_v60 = vpack.c.bf16 %v724_v57, %v724_v57 }
 0x1d9   :  { %1352 = vmatmul.mubr.msk.bf16.vlgmr.msra.gmra.mrb[20].mxu0 %vm813_vm2, %v727_v59 }
 0x1da   :  { %1364 = vmatmul.mubr.msk.bf16.vlgmr.msra.gmra.mrb[20].mxu1 %vm813_vm2, %v728_v60 }
 0x28c   :  { %v851_v63 = vpop.f32.mrb[16].mxu0 }
 0x28d   :  { %v852_v0 = vadd.f32 %v1127_v61, %v851_v63  ;;  %v918_v2 = vpop.f32.mrb[16].mxu1  ;;  %v1329_v3 = vpop.f32.mrb[17].mxu0 }
 0x28e   :  { %v919_v4 = vadd.f32 %v1128_v62, %v918_v2  ;;  %v1341_v5 = vpop.f32.mrb[17].mxu1  ;;  %v854_v6 = vpop.f32.mrb[18].mxu0 }
 0x28f   :  { %1059 = vst.msk [vmem:[#allocation2] sm:$0x3] %vm1058_vm3, %v852_v0  ;;  %v921_v7 = vpop.f32.mrb[18].mxu1  ;;  %v1330_v8 = vpop.f32.mrb[19].mxu0 }
 0x290   :  { %1060 = vst.msk [vmem:[#allocation2 + $0x2] sm:$0x3] %vm1058_vm3, %v919_v4  ;;  %v1342_v9 = vpop.f32.mrb[19].mxu1 }
 0x2ac   :  { %v985_v12 = vpop.f32.mrb[20].mxu0 }
 0x2ad   :  { %v986_v13 = vadd.f32 %v1129_v10, %v985_v12  ;;  %v1052_v14 = vpop.f32.mrb[20].mxu1  ;;  %v1353_v15 = vpop.f32.mrb[21].mxu0 }
 0x2ae   :  { %v1053_v16 = vadd.f32 %v1130_v11, %v1052_v14  ;;  %v1365_v17 = vpop.f32.mrb[21].mxu1  ;;  %v988_v18 = vpop.f32.mrb[22].mxu0 }
 0x2af   :  { %1061 = vst.msk [vmem:[#allocation2 + $0x4] sm:$0x3] %vm1058_vm3, %v986_v13  ;;  %v1055_v19 = vpop.f32.mrb[22].mxu1  ;;  %v1354_v20 = vpop.f32.mrb[23].mxu0 }
 0x2b0   :  { %1062 = vst.msk [vmem:[#allocation2 + $0x6] sm:$0x3] %vm1058_vm3, %v1053_v16  ;;  %v1366_v21 = vpop.f32.mrb[23].mxu1 }
 0x2b1   :  { %1435 = shalt.err (!%p1432_p4)
}
 0x2b2   :  { %s1436_s2 = scalar_lea.hbm %s1804_s7, 128 }
 0x2b3   :  { %p1437_p5 = scmp.ne.s32.totalorder %s1804_s7, %s1436_s2  ;;  %p1440_p6 = scmp.lt.u32.totalorder %s1436_s2, %s1804_s7 }
 0x2b5   :  { %p1442_p7 = pnand %p1440_p6, %p1437_p5 }
 0x2b7   :  { %1445 = shalt.err (!%p1442_p7)
}
 0x2b8   :  { %s1451_s14 = smov 32   ;;  %s1452_s15 = smov 2  }
 0x2b9   :  { %1074 = dma.vmem_to_hbm [thread:$0]  %s1069_s28, 128, %s1804_s7, [#allocation3], %s1451_s14, %s1451_s14, %s1452_s15  }
 0x2ba   :  { %1446 = dma.done.wait [#allocation3], 128  }
 0x2bb   :  { %1447 = vsyncadd [#allocation3], 4294967168 }
 0x2bc   :  { %1078 = vsyncpa [#allocation3], 1 }

</bundles_post_ra>
